<compile_context>
chip_gen: v7x
topology: tpu7x:2x2x1
jax: 0.10.0
libtpu: 0.0.40
codegen_flags: <defaults>
</compile_context>

<pallas_src>
import functools

import jax
import jax.numpy as jnp
from jax import lax
from jax.experimental import pallas as pl
from jax.experimental.pallas import tpu as pltpu


_DEFAULT_TOK_BLK = 512       # tokens per grid step (multiple of 8 / 128, big output slab)
_ONEHOT_MAX_VOCAB = 1024     # one-hot MXU gather only for very small vocabularies
_MAX_SMEM_IDS = 16384        # max token ids scalar-prefetched into SMEM per pallas_call
_MAX_INFLIGHT_DMAS = 64      # cap on the HBM row-gather DMA queue depth


def _round_up(x, m):
    return ((x + m - 1) // m) * m


def _vmem_capacity_bytes():
    # Per-core VMEM: 128 MiB on v5e/v6e, 64 MiB on v7x.  Fall back to the
    # tightest (v7x) budget if the query is unavailable.
    try:
        return int(pltpu.get_tpu_info().vmem_capacity_bytes)
    except Exception:
        return 64 * 1024 * 1024


def _chunked(fn, flat_ids, chunk):
    """Run `fn` on <=chunk-sized slices of flat_ids (bounds SMEM id footprint)."""
    t = flat_ids.shape[0]
    if t <= chunk:
        return fn(flat_ids)
    parts = [fn(flat_ids[s:min(s + chunk, t)]) for s in range(0, t, chunk)]
    return jnp.concatenate(parts, axis=0)


# ---------------------------------------------------------------------------
# Path 1 (tiny vocab): VMEM-resident table, one-hot MXU row-select.
# ---------------------------------------------------------------------------
def _embed_onehot_kernel(ids_ref, table_ref, out_ref, *, precision):
    # ids_ref:   (TOK_BLK, 1) int32 block of token ids
    # table_ref: (V, Dp) VMEM-resident embedding table (constant index_map)
    # out_ref:   (TOK_BLK, Dp) output slab (sublane/lane dense)
    tok_blk = out_ref.shape[0]
    vocab = table_ref.shape[0]
    ids = ids_ref[...]                                               # (TOK_BLK, 1)
    onehot = (ids == lax.broadcasted_iota(jnp.int32, (tok_blk, vocab), 1))
    onehot = onehot.astype(table_ref.dtype)                          # (TOK_BLK, V)
    gathered = lax.dot_general(
        onehot, table_ref[...],
        dimension_numbers=(((1,), (0,)), ((), ())),
        precision=precision,                      # bit-exact row select
        preferred_element_type=jnp.float32,
    )
    out_ref[...] = gathered.astype(out_ref.dtype)


def _embed_onehot(flat_ids, table, tok_blk, vmem_limit_bytes):
    (t_total,) = flat_ids.shape
    vocab, dim = table.shape
    t_pad = _round_up(t_total, tok_blk)
    ids_col = jnp.pad(flat_ids, (0, t_pad - t_total)).reshape(t_pad, 1)
    num_blocks = t_pad // tok_blk

    # bf16 table: single-pass bf16 matmul is already exact (one-hot is exact in
    # bf16).  f32 table: HIGHEST (bf16 multi-pass) reconstructs f32 rows exactly.
    precision = (lax.Precision.DEFAULT if table.dtype == jnp.bfloat16
                 else lax.Precision.HIGHEST)
    kernel = functools.partial(_embed_onehot_kernel, precision=precision)

    out = pl.pallas_call(
        kernel,
        out_shape=jax.ShapeDtypeStruct((t_pad, dim), table.dtype),
        grid=(num_blocks,),
        in_specs=[
            pl.BlockSpec((tok_blk, 1), lambda i: (i, 0)),     # ids block
            pl.BlockSpec((vocab, dim), lambda i: (0, 0)),     # resident table
        ],
        out_specs=pl.BlockSpec((tok_blk, dim), lambda i: (i, 0)),
        compiler_params=pltpu.CompilerParams(
            dimension_semantics=("parallel",),                # independent blocks
            vmem_limit_bytes=int(vmem_limit_bytes),
        ),
    )(ids_col, table)
    return out[:t_total]


# ---------------------------------------------------------------------------
# Path 2 (medium vocab): VMEM-resident table, per-row dynamic-slice gather.
# ---------------------------------------------------------------------------
def _embed_vmem_gather_kernel(ids_ref, table_ref, out_ref):
    # ids_ref:   (T_pad,) int32 chunk of ids in SMEM (scalar prefetch)
    # table_ref: (V, Dp) table resident in VMEM (constant index_map -> one fetch)
    # out_ref:   (TOK_BLK, Dp) output slab
    tok_blk = out_ref.shape[0]
    base = pl.program_id(0) * tok_blk

    def body(t, carry):
        row = ids_ref[base + t]
        out_ref[pl.ds(t, 1), :] = table_ref[pl.ds(row, 1), :]
        return carry

    lax.fori_loop(0, tok_blk, body, 0, unroll=min(8, tok_blk))


def _embed_vmem_gather(flat_ids, table, tok_blk, vmem_limit_bytes):
    (t_total,) = flat_ids.shape
    vocab, dim = table.shape
    t_pad = _round_up(t_total, tok_blk)
    ids = jnp.pad(flat_ids, (0, t_pad - t_total))      # pad with id 0 (valid)
    num_blocks = t_pad // tok_blk

    out = pl.pallas_call(
        _embed_vmem_gather_kernel,
        out_shape=jax.ShapeDtypeStruct((t_pad, dim), table.dtype),
        grid_spec=pltpu.PrefetchScalarGridSpec(
            num_scalar_prefetch=1,                                   # ids -> SMEM
            grid=(num_blocks,),
            in_specs=[pl.BlockSpec((vocab, dim), lambda i, ids_ref: (0, 0))],
            out_specs=pl.BlockSpec((tok_blk, dim), lambda i, ids_ref: (i, 0)),
        ),
        compiler_params=pltpu.CompilerParams(
            dimension_semantics=("parallel",),
            vmem_limit_bytes=int(vmem_limit_bytes),
        ),
    )(ids, table)
    return out[:t_total]


# ---------------------------------------------------------------------------
# Path 3 (large vocab): table stays in HBM, deep row-DMA gather queue.
# ---------------------------------------------------------------------------
def _embed_hbm_gather_kernel(ids_ref, table_hbm, out_ref, sems, *, n_inflight):
    # ids_ref:   (T_pad,) int32 chunk of ids in SMEM (scalar prefetch)
    # table_hbm: (V, D) embedding table left in HBM (memory_space=pl.ANY)
    # out_ref:   (TOK_BLK, D) output slab in VMEM
    # sems:      (n_inflight,) DMA semaphores
    tok_blk = out_ref.shape[0]
    base = pl.program_id(0) * tok_blk

    def start_row(t):
        # SMEM id read + descriptor issue; the row lands directly in the out tile.
        row = ids_ref[base + t]
        pltpu.make_async_copy(
            table_hbm.at[pl.ds(row, 1), :],
            out_ref.at[pl.ds(t, 1), :],
            sems.at[t & (n_inflight - 1)],
        ).start()

    def wait_row(t):
        # Source index is irrelevant for a wait; only sizes/semaphore matter.
        pltpu.make_async_copy(
            table_hbm.at[pl.ds(0, 1), :],
            out_ref.at[pl.ds(t, 1), :],
            sems.at[t & (n_inflight - 1)],
        ).wait()

    # Prime the DMA queue (static unroll).
    for t in range(min(n_inflight, tok_blk)):
        start_row(t)

    def body(t, carry):
        # Issue the replacement DMA *before* waiting so the SMEM id read and
        # descriptor construction aren't stalled behind .wait().
        @pl.when(t + n_inflight < tok_blk)
        def _():
            start_row(t + n_inflight)
        wait_row(t)                      # row t is now resident in out_ref[t, :]
        return carry

    lax.fori_loop(0, tok_blk, body, 0, unroll=min(8, tok_blk))


def _embed_hbm_gather(flat_ids, table, tok_blk):
    (t_total,) = flat_ids.shape
    vocab, dim = table.shape
    itemsize = jnp.dtype(table.dtype).itemsize
    row_bytes = dim * itemsize
    # Target ~1 MiB of row bytes in flight to cover HBM latency; power of two,
    # clamped to [8, _MAX_INFLIGHT_DMAS].
    n = max(8, min(_MAX_INFLIGHT_DMAS, (1 << 20) // max(row_bytes, 1)))
    n_inflight = 1 << (int(n).bit_length() - 1)

    t_pad = _round_up(t_total, tok_blk)
    ids = jnp.pad(flat_ids, (0, t_pad - t_total))      # pad with id 0 (valid)
    num_blocks = t_pad // tok_blk
    kernel = functools.partial(_embed_hbm_gather_kernel, n_inflight=n_inflight)

    out = pl.pallas_call(
        kernel,
        out_shape=jax.ShapeDtypeStruct((t_pad, dim), table.dtype),
        grid_spec=pltpu.PrefetchScalarGridSpec(
            num_scalar_prefetch=1,                              # ids chunk -> SMEM
            grid=(num_blocks,),
            in_specs=[pl.BlockSpec(memory_space=pl.ANY)],       # table stays in HBM
            out_specs=pl.BlockSpec((tok_blk, dim), lambda i, ids_ref: (i, 0)),
            scratch_shapes=[pltpu.SemaphoreType.DMA((n_inflight,))],
        ),
        compiler_params=pltpu.CompilerParams(
            dimension_semantics=("parallel",),
        ),
    )(ids, table)
    return out[:t_total]


# ---------------------------------------------------------------------------
# Dispatcher + module
# ---------------------------------------------------------------------------
def embed_pallas(x, table, *, tok_blk=None, impl="auto"):
    """x: int token ids (any shape), table: (V, D) -> x.shape + (D,)."""
    lead_shape = x.shape
    vocab, dim = table.shape
    # TODO(synk): torch raises on out-of-range ids; we clamp (no OOB DMA / zero rows).
    flat_ids = jnp.clip(x.reshape(-1).astype(jnp.int32), 0, vocab - 1)
    t_total = int(flat_ids.shape[0])
    if t_total == 0:
        return jnp.zeros((*lead_shape, dim), table.dtype)

    if tok_blk is None:
        tok_blk = _DEFAULT_TOK_BLK
    # Multiple of 8 (sublane-dense stores); no bigger than the padded problem.
    tok_blk = max(8, min(_round_up(int(tok_blk), 8), _round_up(t_total, 8)))

    itemsize = jnp.dtype(table.dtype).itemsize
    dim_p = _round_up(dim, 128)              # lane-dense output for resident paths
    vmem_cap = _vmem_capacity_bytes()

    # VMEM needed if the table is kept resident (the pipeline still allocates
    # two table buffers even with a constant index_map -> 2x term).
    resident_need = (2 * vocab * dim_p * itemsize
                     + 2 * tok_blk * dim_p * itemsize
                     + 2 * tok_blk * 4 + (1 << 20))
    fits_vmem = resident_need <= int(0.7 * vmem_cap)

    if impl == "auto":
        if fits_vmem and vocab <= _ONEHOT_MAX_VOCAB:
            impl = "onehot"
        elif fits_vmem:
            impl = "vmem_gather"
        else:
            impl = "hbm_gather"

    chunk = max(tok_blk, (_MAX_SMEM_IDS // tok_blk) * tok_blk)

    if impl in ("onehot", "vmem_gather"):
        table_k = (table if dim_p == dim
                   else jnp.pad(table, ((0, 0), (0, dim_p - dim))))
        vmem_limit = min(resident_need + (8 << 20), int(0.9 * vmem_cap))
        if impl == "onehot":
            out_flat = _embed_onehot(flat_ids, table_k, tok_blk, vmem_limit)
        else:
            out_flat = _chunked(
                lambda ids: _embed_vmem_gather(ids, table_k, tok_blk, vmem_limit),
                flat_ids, chunk)
        if dim_p != dim:
            out_flat = out_flat[:, :dim]
    elif impl == "hbm_gather":
        out_flat = _chunked(
            lambda ids: _embed_hbm_gather(ids, table, tok_blk),
            flat_ids, chunk)
    else:
        raise ValueError(f"unknown impl {impl!r}")

    return out_flat.reshape(*lead_shape, dim)


class Embed:
    """JAX/Pallas port of the PyTorch `Embed` module (nn.Embedding lookup)."""

    def __init__(self, vocab_sz, emb_dim, key):
        # nn.Embedding default init: weight ~ N(0, 1), shape (vocab_sz, emb_dim).
        self.weight = jax.random.normal(key, (vocab_sz, emb_dim), dtype=jnp.float32)

    def __call__(self, x):
        return embed_pallas(x, self.weight)


if __name__ == "__main__":
    key = jax.random.PRNGKey(0)
    k_w, k_ids = jax.random.split(key)

    VOCAB_SZ = 64
    EMB_DIM = 128
    BATCH = 2
    SEQ = 8

    module = Embed(VOCAB_SZ, EMB_DIM, k_w)
    x = jax.random.randint(k_ids, (BATCH, SEQ), minval=0, maxval=VOCAB_SZ,
                           dtype=jnp.int32)

    ref = jnp.take(module.weight, x.reshape(-1), axis=0).reshape(BATCH, SEQ, EMB_DIM)

    # Auto path (tiny vocab -> one-hot MXU gather with the table in VMEM).
    out = jax.block_until_ready(module(x))
    assert out.shape == (BATCH, SEQ, EMB_DIM)
    assert jnp.allclose(out, ref, atol=1e-6, rtol=1e-6), \
        "Pallas embedding (one-hot path) mismatch vs reference"

    # Medium-vocab path: table resident in VMEM, per-row dynamic-slice gather.
    out_g = jax.block_until_ready(
        embed_pallas(x, module.weight, impl="vmem_gather"))
    assert jnp.array_equal(out_g, ref), \
        "Pallas embedding (VMEM-gather path) mismatch vs reference"

    # Large-vocab path: table left in HBM, row-DMA gather queue.
    out_h = jax.block_until_ready(
        embed_pallas(x, module.weight, impl="hbm_gather"))
    assert jnp.array_equal(out_h, ref), \
        "Pallas embedding (HBM-gather path) mismatch vs reference"

    print("KERNEL_OK")
</pallas_src>

<mosaic_0001>
module attributes {stable_mosaic.version = 11 : i64} {
  func.func @_embed_onehot_kernel(%arg0: i32, %arg1: memref<16x1xi32, #tpu.memory_space<vmem>>, %arg2: memref<64x128xf32, #tpu.memory_space<vmem>>, %arg3: memref<16x128xf32, #tpu.memory_space<vmem>>) attributes {dimension_semantics = [#tpu.dimension_semantics<parallel>], iteration_bounds = array<i64: 1>, scalar_prefetch = 0 : i64, scratch_operands = 0 : i64, tpu.core_type = #tpu.core_type<tc>, window_params = [{transform_indices = @transform_0, window_bounds = array<i64: 16, 1>}, {pipeline_mode = #tpu.pipeline_mode<synchronous>, transform_indices = @transform_1, window_bounds = array<i64: 64, 128>}, {transform_indices = @transform_2, window_bounds = array<i64: 16, 128>}]} {
    %c0 = arith.constant 0 : index
    %c0_0 = arith.constant 0 : index
    %0 = vector.load %arg1[%c0, %c0_0] : memref<16x1xi32, #tpu.memory_space<vmem>>, vector<16x1xi32>
    %1 = tpu.iota {dimensions = array<i32: 1>} : vector<16x64xi32>
    %2 = vector.broadcast %0 : vector<16x1xi32> to vector<16x64xi32>
    %3 = arith.cmpi eq, %2, %1 : vector<16x64xi32>
    %4 = arith.extui %3 : vector<16x64xi1> to vector<16x64xi32>
    %5 = arith.sitofp %4 : vector<16x64xi32> to vector<16x64xf32>
    %c0_1 = arith.constant 0 : index
    %c0_2 = arith.constant 0 : index
    %6 = vector.load %arg2[%c0_1, %c0_2] : memref<64x128xf32, #tpu.memory_space<vmem>>, vector<64x128xf32>
    %cst = arith.constant dense<0.000000e+00> : vector<16x128xf32>
    %7 = tpu.matmul %5, %6, %cst {dimension_numbers = #tpu.dot_dimension_numbers<[1], [0], [0], [1], [0, 0, 1, 1], [], []>, precision = #tpu.contract_precision<fp32>} : vector<16x64xf32>, vector<64x128xf32>, vector<16x128xf32> -> vector<16x128xf32>
    %c0_3 = arith.constant 0 : index
    %c0_4 = arith.constant 0 : index
    %8 = vector.load %arg3[%c0_3, %c0_4] : memref<16x128xf32, #tpu.memory_space<vmem>>, vector<16x128xf32>
    tpu.vector_store %arg3[%c0_3, %c0_4], %7 {strides = array<i32>} : memref<16x128xf32, #tpu.memory_space<vmem>>, vector<16x128xf32>,
    return
  }
  func.func @transform_0(%arg0: i32) -> (i32, i32) {
    %c0_i32 = arith.constant 0 : i32
    %c0_i32_0 = arith.constant 0 : i32
    return %arg0, %c0_i32 : i32, i32
  }
  func.func @transform_1(%arg0: i32) -> (i32, i32) {
    %c0_i32 = arith.constant 0 : i32
    %c0_i32_0 = arith.constant 0 : i32
    %c0_i32_1 = arith.constant 0 : i32
    return %c0_i32, %c0_i32_0 : i32, i32
  }
  func.func @transform_2(%arg0: i32) -> (i32, i32) {
    %c0_i32 = arith.constant 0 : i32
    %c0_i32_0 = arith.constant 0 : i32
    return %arg0, %c0_i32 : i32, i32
  }
}

</mosaic_0001>

<bundles_post_ra>
// kernel: tpu_custom_call.1
= control target key start
LH: loop header
LB: loop body
LE: loop exit
PB: predicated region body
PF: predicated region fallthrough
CT: control target
= control target key end

     0   :  { %7 = vsyncpa [#allocation3], 0  ;;  %s1100_s0 = inlined_call_operand.vmem [shape: s32[16,1], index: 0, kind: input, shape index: {}]   ;;  %s1101_s1 = inlined_call_operand.hbm [shape: f32[64,128], index: 1, kind: input, shape index: {}]   ;;  %s1102_s2 = inlined_call_operand.hbm [shape: f32[16,128], index: 2, kind: output, shape index: {}]  }
   0x1   :  { %8 = vsyncpa [#allocation4], 0  ;;  %s999_s9 = smov [#allocation2]   ;;  %s951_s13 = scalar_lea.hbm %s1101_s1, 1024 }
   0x2   :  { %s16_s10 = sshll.u32 %s999_s9, 4  ;;  %p952_p0 = scmp.ne.s32.totalorder %s1101_s1, %s951_s13  ;;  %s17_s10 = int_to_ptr.vmem [resolvable:$true] %s16_s10 }
   0x3   :  { %p955_p1 = scmp.lt.u32.totalorder %s951_s13, %s1101_s1 }
   0x5   :  { %p957_p2 = pnand %p955_p1, %p952_p0 }
   0x7   :  { %960 = shalt.err (!%p957_p2)
}
   0x8   :  { %s961_s18 = scalar_lea.vmem %s17_s10, 1024  ;;  %p966_p4 = scmp.lt.s32.totalorder %s17_s10, %s17_s10 }
   0x9   :  { %p962_p3 = scmp.ne.s32.totalorder %s17_s10, %s961_s18  ;;  %p967_p5 = scmp.lt.s32.totalorder %s961_s18, %s961_s18 }
   0xb   :  { %p968_p6 = por %p967_p5, %p966_p4 }
   0xd   :  { %p969_p7 = pnand %p968_p6, %p962_p3 }
   0xf   :  { %972 = shalt.err (!%p969_p7)
}
  0x10   :  { %s1000_s19 = smov 128   ;;  %s1001_s20 = smov 8  }
  0x11   :  { %22 = dma.hbm_to_vmem [thread:$0]  %s1101_s1, 1024, %s17_s10, [#allocation3], %s1000_s19, %s1000_s19, %s1001_s20  }
  0x12   :  { %995 = dma.done.wait [#allocation3], 1024  }
  0x13   :  { %996 = vsyncadd [#allocation3], 4294966272  ;;  %v1002_v0 = vmov 0   ;;  %v26_v1 = vld [vmem:[%s1100_s0] sm:$0xff]  ;;  %v43_v3 = vld [vmem:[#allocation2 + $0x8] sm:$0xff]  ;;  %vm50_vm0 = vcmask 523264  }
  0x14   :  { %950 = vset.pattern.permute.xlu0 %v1002_v0  ;;  %v42_v2 = vld [vmem:[#allocation2] sm:$0xff]  ;;  %v44_v5 = vld [vmem:[#allocation2 + $0x10] sm:$0xff]  ;;  %v45_v6 = vld [vmem:[#allocation2 + $0x18] sm:$0xff]  ;;  %v61_v8 = vand.u32 4294901760, %v43_v3 }
  0x15   :  { %31 = vperm.xlu0 %950, %v26_v1   ;;  %v58_v4 = vand.u32 4294901760, %v42_v2  ;;  %v27_v7 = vld [vmem:[%s1100_s0 + $0x8] sm:$0xff]  ;;  %v64_v9 = vand.u32 4294901760, %v44_v5  ;;  %v67_v10 = vand.u32 4294901760, %v45_v6  ;;  %v46_v11 = vld [vmem:[#allocation2 + $0x20] sm:$0xff]  ;;  %v48_v17 = vld [vmem:[#allocation2 + $0x30] sm:$0xff] }
  0x16   :  { %v47_v12 = vld [vmem:[#allocation2 + $0x28] sm:$0xff]  ;;  %v70_v15 = vand.u32 4294901760, %v46_v11  ;;  %v49_v18 = vld [vmem:[#allocation2 + $0x38] sm:$0xff]  ;;  %v159_v20 = vsub.f32 %v43_v3, %v61_v8  ;;  %v76_v21 = vand.u32 4294901760, %v48_v17  ;;  %v28_v3 = vlaneseq  ;;  %s1004_s0 = smov [#allocation5]  }
  0x17   :  { %v1041_v13 = vpack.c.bf16 %v61_v8, %v58_v4  ;;  %v1043_v14 = vpack.c.bf16 %v67_v10, %v64_v9  ;;  %v73_v16 = vand.u32 4294901760, %v47_v12  ;;  %v152_v19 = vsub.f32 %v42_v2, %v58_v4  ;;  %s644_s1 = sshll.u32 %s1004_s0, 4  ;;  %s645_s1 = int_to_ptr.vmem [resolvable:$true] %s644_s1 }
  0x18   :  { %v79_v22 = vand.u32 4294901760, %v49_v18  ;;  %v160_v24 = vand.u32 4294901760, %v159_v20  ;;  %v166_v28 = vsub.f32 %v44_v5, %v64_v9  ;;  %v173_v29 = vsub.f32 %v45_v6, %v67_v10  ;;  %s973_s27 = scalar_lea.vmem %s645_s1, 256  ;;  %p978_p9 = scmp.lt.s32.totalorder %s645_s1, %s645_s1 }
  0x19   :  { %34 = vperm.xlu0 %950, %v27_v7   ;;  %887 = vmatprep.subr.bf16.mxu0 %v1041_v13  ;;  %v153_v23 = vand.u32 4294901760, %v152_v19  ;;  %v1051_v25 = vpack.c.bf16 %v73_v16, %v70_v15  ;;  %v180_v38 = vsub.f32 %v46_v11, %v70_v15  ;;  %v187_v39 = vsub.f32 %v47_v12, %v73_v16  ;;  %p974_p8 = scmp.ne.s32.totalorder %s645_s1, %s973_s27  ;;  %p979_p10 = scmp.lt.s32.totalorder %s973_s27, %s973_s27 }
  0x1a   :  { %839 = vmatprep.subr.bf16.mxu1 %v1041_v13  ;;  %889 = vmatpush3.bf16.msra.mxu0 %v1041_v13  ;;  %v161_v27 = vsub.f32 %v159_v20, %v160_v24  ;;  %v1055_v30 = vpack.c.bf16 %v79_v22, %v76_v21  ;;  %v167_v33 = vand.u32 4294901760, %v166_v28  ;;  %v174_v34 = vand.u32 4294901760, %v173_v29 }
  0x1b   :  { %841 = vmatpush3.bf16.msra.mxu1 %v1041_v13  ;;  %891 = vmatprep.subr.bf16.mxu0 %v1043_v14  ;;  %v154_v26 = vsub.f32 %v152_v19, %v153_v23  ;;  %v902_v40 = vpack.c.bf16 %v160_v24, %v153_v23  ;;  %v181_v44 = vand.u32 4294901760, %v180_v38  ;;  %v188_v45 = vand.u32 4294901760, %v187_v39  ;;  %p980_p11 = por %p979_p10, %p978_p9 }
  0x1c   :  { %843 = vmatprep.subr.bf16.mxu1 %v1043_v14  ;;  %v162_v32 = vand.u32 4294901760, %v161_v27  ;;  %v1059_v35 = vpack.c.bf16 %v174_v34, %v167_v33  ;;  %v168_v36 = vsub.f32 %v166_v28, %v167_v33  ;;  %v175_v37 = vsub.f32 %v173_v29, %v174_v34 }
  0x1d   :  { %v155_v31 = vand.u32 4294901760, %v154_v26  ;;  %v194_v47 = vsub.f32 %v48_v17, %v76_v21  ;;  %v201_v48 = vsub.f32 %v49_v18, %v79_v22  ;;  %v910_v49 = vpack.c.bf16 %v188_v45, %v181_v44  ;;  %p981_p12 = pnand %p980_p11, %p974_p8 }
  0x1e   :  { %893 = vmatpush3.bf16.msra.mxu0 %v1043_v14  ;;  %v169_v42 = vand.u32 4294901760, %v168_v36  ;;  %v176_v43 = vand.u32 4294901760, %v175_v37  ;;  %v182_v50 = vsub.f32 %v180_v38, %v181_v44  ;;  %v189_v51 = vsub.f32 %v187_v39, %v188_v45 }
  0x1f   :  { %845 = vmatpush3.bf16.msra.mxu1 %v1043_v14  ;;  %895 = vmatprep.subr.bf16.mxu0 %v1051_v25  ;;  %v854_v41 = vpack.c.bf16 %v162_v32, %v155_v31  ;;  %v195_v52 = vand.u32 4294901760, %v194_v47  ;;  %v202_v53 = vand.u32 4294901760, %v201_v48  ;;  %v870_v63 = vpack.c.bf16 %v159_v20, %v152_v19 }
  0x20   :  { %847 = vmatprep.subr.bf16.mxu1 %v1051_v25  ;;  %v858_v46 = vpack.c.bf16 %v176_v43, %v169_v42  ;;  %v183_v54 = vand.u32 4294901760, %v182_v50  ;;  %v190_v55 = vand.u32 4294901760, %v189_v51  ;;  %v874_v0 = vpack.c.bf16 %v173_v29, %v166_v28 }
  0x21   :  { %v914_v56 = vpack.c.bf16 %v202_v53, %v195_v52  ;;  %v196_v57 = vsub.f32 %v194_v47, %v195_v52  ;;  %v203_v58 = vsub.f32 %v201_v48, %v202_v53  ;;  %v878_v1 = vpack.c.bf16 %v187_v39, %v180_v38 }
  0x22   :  { %897 = vmatpush3.bf16.msra.mxu0 %v1051_v25  ;;  %v862_v59 = vpack.c.bf16 %v190_v55, %v183_v54  ;;  %v882_v2 = vpack.c.bf16 %v201_v48, %v194_v47  ;;  %v29_v4 = vand.u32 127, %v28_v3  ;;  %v1003_v6 = vmov 0.0  }
  0x23   :  { %849 = vmatpush3.bf16.msra.mxu1 %v1051_v25  ;;  %899 = vmatprep.subr.bf16.mxu0 %v1055_v30  ;;  %v197_v60 = vand.u32 4294901760, %v196_v57  ;;  %v204_v61 = vand.u32 4294901760, %v203_v58 }
  0x24   :  { %851 = vmatprep.subr.bf16.mxu1 %v1055_v30 }
  0x25   :  { %v866_v62 = vpack.c.bf16 %v204_v61, %v197_v60 }
  0x26   :  { %901 = vmatpush3.bf16.msra.mxu0 %v1055_v30 }
  0x27   :  { %853 = vmatpush3.bf16.msra.mxu1 %v1055_v30  ;;  %903 = vmatprep.subr.bf16.mxu0 %v902_v40 }
  0x28   :  { %855 = vmatprep.subr.bf16.mxu1 %v854_v41 }
  0x94   :  { %v32_v5 = vpop.permute.xlu0 %31 }
  0x95   :  { %vm36_vm1 = vcmp.eq.s32.totalorder %v32_v5, %v29_v4 }
  0x96   :  { %v656_v7 = vsel %vm36_vm1, 1.0, %v1003_v6 }
  0x97   :  { %v52_v8 = vsel %vm50_vm0, %v656_v7, 0 }
  0x98   :  { %v131_v9 = vsub.f32 %v52_v8, %v52_v8  ;;  %v35_v10 = vpop.permute.xlu0 %34 }
  0x99   :  { %vm37_vm2 = vcmp.eq.s32.totalorder %v35_v10, %v29_v4 }
  0x9a   :  { %v657_v11 = vsel %vm37_vm2, 1.0, %v1003_v6  ;;  %v132_v12 = vand.u32 4294901760, %v131_v9 }
  0x9b   :  { %v55_v15 = vsel %vm50_vm0, %v657_v11, 0 }
  0x9c   :  { %v141_v16 = vsub.f32 %v55_v15, %v55_v15  ;;  %797 = vmatprep.mubr.f32.mxu0 %v132_v12  ;;  %v133_v17 = vsub.f32 %v131_v9, %v132_v12 }
  0x9e   :  { %v134_v18 = vand.u32 4294901760, %v133_v17  ;;  %v142_v19 = vand.u32 4294901760, %v141_v16 }
  0xa0   :  { %740 = vmatprep.mubr.f32.mxu1 %v134_v18  ;;  %798 = vmatmul.mubr.f32.vlgmr.msra.gmra.mrb[0].mxu0 %v142_v19  ;;  %v143_v20 = vsub.f32 %v141_v16, %v142_v19 }
  0xa1   :  { %905 = vmatpush3.bf16.msra.mxu0 %v902_v40  ;;  %816 = vmatprep.mubr.msk.f32.mxu0 %vm50_vm0, %v656_v7 }
  0xa2   :  { %907 = vmatprep.subr.bf16.mxu0 %v1059_v35  ;;  %v144_v21 = vand.u32 4294901760, %v143_v20 }
  0xa4   :  { %741 = vmatmul.mubr.f32.vlgmr.msra.gmra.mrb[0].mxu1 %v144_v21 }
  0xa5   :  { %857 = vmatpush3.bf16.msra.mxu1 %v854_v41  ;;  %909 = vmatpush3.bf16.msra.mxu0 %v1059_v35 }
  0xa6   :  { %759 = vmatprep.mubr.msk.f32.mxu1 %vm50_vm0, %v656_v7  ;;  %859 = vmatprep.subr.bf16.mxu1 %v858_v46 }
  0xa7   :  { %911 = vmatprep.subr.bf16.mxu0 %v910_v49 }
  0xa9   :  { %861 = vmatpush3.bf16.msra.mxu1 %v858_v46  ;;  %913 = vmatpush3.bf16.msra.mxu0 %v910_v49 }
  0xaa   :  { %863 = vmatprep.subr.bf16.mxu1 %v862_v59  ;;  %915 = vmatprep.subr.bf16.mxu0 %v914_v56 }
  0xad   :  { %865 = vmatpush3.bf16.msra.mxu1 %v862_v59  ;;  %917 = vmatpush3.bf16.msra.mxu0 %v914_v56 }
  0xae   :  { %867 = vmatprep.subr.bf16.mxu1 %v866_v62  ;;  %919 = vmatprep.subr.bf16.mxu0 %v1041_v13 }
  0xb0   :  { %817 = vmatmul.mubr.msk.f32.vlgmr.msra.gmra.mrb[0].mxu0 %vm50_vm0, %v657_v11 }
  0xb1   :  { %869 = vmatpush3.bf16.msra.mxu1 %v866_v62  ;;  %921 = vmatpush3.bf16.msra.mxu0 %v1041_v13 }
  0xb2   :  { %835 = vmatprep.mubr.msk.f32.mxu0 %vm50_vm0, %v656_v7  ;;  %871 = vmatprep.subr.bf16.mxu1 %v870_v63 }
  0xb3   :  { %923 = vmatprep.subr.bf16.mxu0 %v1043_v14 }
  0xb4   :  { %760 = vmatmul.mubr.msk.f32.vlgmr.msra.gmra.mrb[0].mxu1 %vm50_vm0, %v657_v11 }
  0xb5   :  { %873 = vmatpush3.bf16.msra.mxu1 %v870_v63  ;;  %778 = vmatprep.mubr.f32.mxu1 %v131_v9 }
  0xb6   :  { %925 = vmatpush3.bf16.msra.mxu0 %v1043_v14  ;;  %875 = vmatprep.subr.bf16.mxu1 %v874_v0 }
  0xb7   :  { %927 = vmatprep.subr.bf16.mxu0 %v1051_v25 }
  0xb9   :  { %877 = vmatpush3.bf16.msra.mxu1 %v874_v0 }
  0xba   :  { %929 = vmatpush3.bf16.msra.mxu0 %v1051_v25  ;;  %879 = vmatprep.subr.bf16.mxu1 %v878_v1 }
  0xbb   :  { %931 = vmatprep.subr.bf16.mxu0 %v1055_v30 }
  0xbd   :  { %881 = vmatpush3.bf16.msra.mxu1 %v878_v1 }
  0xbe   :  { %933 = vmatpush3.bf16.msra.mxu0 %v1055_v30  ;;  %883 = vmatprep.subr.bf16.mxu1 %v882_v2 }
  0xc1   :  { %836 = vmatmul.mubr.msk.f32.vlgmr.msra.gmra.mrb[0].mxu0 %vm50_vm0, %v657_v11  ;;  %885 = vmatpush3.bf16.msra.mxu1 %v882_v2 }
  0xc4   :  { %779 = vmatmul.mubr.f32.vlgmr.msra.gmra.mrb[0].mxu1 %v141_v16 }
 0x194   :  { %v837_v13 = vpop.f32.mrb[0].mxu0 }
 0x195   :  { %v627_v22 = vpop.f32.mrb[1].mxu0 }
 0x197   :  { %v780_v14 = vpop.f32.mrb[0].mxu1 }
 0x198   :  { %v934_v23 = vadd.f32 %v837_v13, %v780_v14  ;;  %v351_v24 = vpop.f32.mrb[1].mxu1 }
 0x199   :  { %v935_v26 = vadd.f32 %v627_v22, %v351_v24 }
 0x19a   :  { %638 = vst [vmem:[#allocation5 + $0x8] sm:$0xff] %v934_v23 }
 0x19b   :  { %637 = vst [vmem:[#allocation5] sm:$0xff] %v935_v26 }
 0x19c   :  { %984 = shalt.err (!%p981_p12)
}
 0x19d   :  { %s985_s30 = scalar_lea.hbm %s1102_s2, 256 }
 0x19e   :  { %p986_p13 = scmp.ne.s32.totalorder %s1102_s2, %s985_s30  ;;  %p989_p0 = scmp.lt.u32.totalorder %s985_s30, %s1102_s2 }
 0x1a0   :  { %p991_p1 = pnand %p989_p0, %p986_p13 }
 0x1a2   :  { %994 = shalt.err (!%p991_p1)
}
 0x1a3   :  { %650 = dma.vmem_to_hbm [thread:$0]  %s645_s1, 256, %s1102_s2, [#allocation4], %s1000_s19, %s1000_s19, %s1001_s20  }
 0x1a4   :  { %997 = dma.done.wait [#allocation4], 256  }
 0x1a5   :  { %998 = vsyncadd [#allocation4], 4294967040 }
 0x1a6   :  { %654 = vsyncpa [#allocation3], 1 }
 0x1a7   :  { %655 = vsyncpa [#allocation4], 1 }

</bundles_post_ra>
